<compile_context>
chip_gen: v6e
topology: v6e:2x2x1
jax: 0.10.0
libtpu: 0.0.40
codegen_flags: <defaults>
</compile_context>

<pallas_src>
import functools

import jax
import jax.numpy as jnp
from jax import lax
from jax.experimental import pallas as pl
from jax.experimental.pallas import tpu as pltpu

_LANES = 128
_CHUNK_ROWS = 16                        # sublanes per compute chunk (native bf16 tile)
_CHUNK_ELEMS = _CHUNK_ROWS * _LANES     # 2048 features per chunk


def _a_lif_kernel(params_ref, x_ref, o_ref):
    """A_LIF recurrence over all T steps for one (T, tile_c, 16, 128) slab.

    params_ref : SMEM f32[3] -> [a = sign/(v_th+1e-8), b = sign, sigmoid(v_decay)]
    x_ref      : VMEM f32[T, tile_c, 16, 128]   input currents
    o_ref      : VMEM bf16[T, tile_c, 16, 128]  output spikes (0.0 / 1.0)
    """
    a = params_ref[0]        # sign * 1/(v_th + 1e-8)
    b = params_ref[1]        # +1 if v_th > 0 else -1
    decay = params_ref[2]    # sigmoid(v_decay)
    T = x_ref.shape[0]
    tile_c = x_ref.shape[1]
    # Bounded unroll: keeps LLO scheduling visibility without code blow-up at big T.
    t_unroll = True if T <= 16 else 8

    @pl.loop(0, tile_c)
    def _(c):
        # t == 0 : membrane = inpt  (reset_parameters)
        mem = x_ref[0, c].astype(jnp.float32)
        pred = (mem * a) > b                                   # == (mem_thr > 0)
        o_ref[0, c] = jnp.where(pred, 1.0, 0.0).astype(o_ref.dtype)
        # Single loop-carry: gated = sigmoid(v_decay) * membrane * (1 - spike)
        gated = jnp.where(pred, 0.0, decay * mem)

        def t_body(t, gated):
            mem = gated + x_ref[t, c].astype(jnp.float32)
            pred = (mem * a) > b
            o_ref[t, c] = jnp.where(pred, 1.0, 0.0).astype(o_ref.dtype)
            return jnp.where(pred, 0.0, decay * mem)

        lax.fori_loop(1, T, t_body, gated, unroll=t_unroll)


def _pick_tile_chunks(T, n_chunks, in_bytes, out_bytes, io_budget_bytes=24 << 20):
    """Chunks (16x128 slabs) per grid step.

    Sized so the double-buffered (input + output) block stays under
    `io_budget_bytes` of VMEM (safe within the 48 MiB limit on v7x's 64 MiB),
    while keeping >= 2 grid steps when possible so v7x's second TensorCore
    gets work via the "parallel" axis.
    """
    per_chunk = 2 * T * _CHUNK_ELEMS * (in_bytes + out_bytes)   # 2 = double buffer
    max_chunks = max(1, io_budget_bytes // per_chunk)
    if n_chunks >= 2:
        max_chunks = min(max_chunks, max(1, n_chunks // 2))
    tile = int(min(n_chunks, max_chunks))
    while n_chunks % tile:
        tile -= 1
    return max(tile, 1)


@functools.partial(jax.jit, static_argnames=("out_dtype",))
def a_lif_forward(x_tbf, v_th, v_decay, out_dtype=jnp.bfloat16):
    """Runs the A_LIF forward recurrence over all T steps.

    x_tbf  : f32[T, N]  (N = B*C*H*W) input currents per time step
    v_th, v_decay : scalar f32 parameters
    Returns spikes (0.0/1.0) of shape [T, N] in `out_dtype` (default bf16,
    exact for binary spikes; pass jnp.float32 to match the PyTorch dtype).
    """
    T, N = x_tbf.shape
    x_tbf = x_tbf.astype(jnp.float32)

    # Pad the feature dim to a multiple of 16*128 so every chunk is a full,
    # aligned (16,128) slab (padded features never affect real ones; sliced off).
    pad_n = (-N) % _CHUNK_ELEMS
    if pad_n:
        x_tbf = jnp.pad(x_tbf, ((0, 0), (0, pad_n)))
    n_p = N + pad_n
    n_chunks = n_p // _CHUNK_ELEMS
    x4 = x_tbf.reshape(T, n_chunks, _CHUNK_ROWS, _LANES)

    in_bytes = x4.dtype.itemsize
    out_bytes = jnp.dtype(out_dtype).itemsize
    tile_c = _pick_tile_chunks(T, n_chunks, in_bytes, out_bytes)

    v_th = jnp.asarray(v_th, jnp.float32)
    v_decay = jnp.asarray(v_decay, jnp.float32)
    sign = jnp.where(v_th > 0, jnp.float32(1.0), jnp.float32(-1.0))
    inv_vth = 1.0 / (v_th + 1e-08)
    # TODO(synk): PyTorch uses a true divide (membrane / (v_th+1e-8)); this
    # reciprocal-multiply fold can differ only for values exactly at the boundary.
    params = jnp.stack([sign * inv_vth, sign, jax.nn.sigmoid(v_decay)]).astype(jnp.float32)

    block = (T, tile_c, _CHUNK_ROWS, _LANES)
    grid_spec = pltpu.PrefetchScalarGridSpec(
        num_scalar_prefetch=0,
        grid=(n_chunks // tile_c,),
        in_specs=[
            pl.BlockSpec(memory_space=pltpu.SMEM),            # params (scalars)
            pl.BlockSpec(block, lambda i: (0, i, 0, 0)),      # x
        ],
        out_specs=pl.BlockSpec(block, lambda i: (0, i, 0, 0)),
    )

    spikes = pl.pallas_call(
        _a_lif_kernel,
        out_shape=jax.ShapeDtypeStruct((T, n_chunks, _CHUNK_ROWS, _LANES), out_dtype),
        grid_spec=grid_spec,
        compiler_params=pltpu.CompilerParams(
            dimension_semantics=("parallel",),   # chunk tiles are independent (megacore)
            vmem_limit_bytes=48 << 20,           # <= v7x's 64 MiB physical VMEM
        ),
    )(params, x4)

    return spikes.reshape(T, n_p)[:, :N]


def a_lif_reference(x_tbf, v_th, v_decay):
    """Pure-JAX reference mirroring the PyTorch A_LIF.forward loop."""
    T = x_tbf.shape[0]
    decay = jax.nn.sigmoid(v_decay)
    inv = 1.0 / (v_th + 1e-08)
    sign = jnp.where(v_th > 0, jnp.float32(1.0), jnp.float32(-1.0))

    def fire(mem):
        return ((sign * (mem * inv - 1.0)) > 0).astype(jnp.float32)

    mem = x_tbf[0]
    spike = fire(mem)
    outs = [spike]
    for t in range(1, T):
        mem = decay * mem * (1.0 - spike) + x_tbf[t]
        spike = fire(mem)
        outs.append(spike)
    return jnp.stack(outs)


if __name__ == "__main__":
    # Per-step conv feature maps NCHW, stacked over T time steps.
    T, B, C, H, W = 8, 2, 4, 16, 16

    key = jax.random.PRNGKey(0)
    x = jax.random.normal(key, (T, B, C, H, W), dtype=jnp.float32)

    v_th = jnp.float32(0.5)       # args.v_th
    v_decay = jnp.float32(0.25)   # args.v_decay

    x_tbf = x.reshape(T, -1)      # (T, B*C*H*W)

    spikes = a_lif_forward(x_tbf, v_th, v_decay)
    spikes = jax.block_until_ready(spikes)

    ref = a_lif_reference(x_tbf, v_th, v_decay)
    assert spikes.shape == x_tbf.shape
    assert jnp.array_equal(spikes.astype(jnp.float32), ref), "Pallas A_LIF mismatch vs reference"

    # back to NCHW per step if desired: spikes.reshape(T, B, C, H, W)
    print("KERNEL_OK")
</pallas_src>

<mosaic_0001>
module attributes {stable_mosaic.version = 11 : i64} {
  func.func @_a_lif_kernel(%arg0: i32, %arg1: memref<3xf32, #tpu.memory_space<smem>>, %arg2: memref<8x1x16x128xf32, #tpu.memory_space<vmem>>, %arg3: memref<8x1x16x128xbf16, #tpu.memory_space<vmem>>) attributes {dimension_semantics = [#tpu.dimension_semantics<parallel>], iteration_bounds = array<i64: 1>, scalar_prefetch = 0 : i64, scratch_operands = 0 : i64, tpu.core_type = #tpu.core_type<tc>, window_params = [{transform_indices = @transform_0, window_bounds = array<i64: 3>}, {transform_indices = @transform_1, window_bounds = array<i64: 8, 1, 16, 128>}, {transform_indices = @transform_2, window_bounds = array<i64: 8, 1, 16, 128>}]} {
    %c0 = arith.constant 0 : index
    %0 = memref.load %arg1[%c0] : memref<3xf32, #tpu.memory_space<smem>>
    %c1 = arith.constant 1 : index
    %1 = memref.load %arg1[%c1] : memref<3xf32, #tpu.memory_space<smem>>
    %c2 = arith.constant 2 : index
    %2 = memref.load %arg1[%c2] : memref<3xf32, #tpu.memory_space<smem>>
    %c0_i32 = arith.constant 0 : i32
    %c1_i32 = arith.constant 1 : i32
    %3 = arith.muli %c0_i32, %c1_i32 : i32
    %c0_i32_0 = arith.constant 0 : i32
    %4 = arith.addi %c0_i32_0, %3 : i32
    %c0_1 = arith.constant 0 : index
    %5 = arith.index_cast %4 : i32 to index
    %c0_2 = arith.constant 0 : index
    %c0_3 = arith.constant 0 : index
    %6 = vector.load %arg2[%c0_1, %5, %c0_2, %c0_3] : memref<8x1x16x128xf32, #tpu.memory_space<vmem>>, vector<1x1x16x128xf32>
    %7 = vector.shape_cast %6 : vector<1x1x16x128xf32> to vector<16x128xf32>
    %8 = vector.broadcast %0 : f32 to vector<16x128xf32>
    %9 = arith.mulf %7, %8 : vector<16x128xf32>
    %10 = vector.broadcast %1 : f32 to vector<16x128xf32>
    %11 = arith.cmpf ogt, %9, %10 : vector<16x128xf32>
    %cst = arith.constant 1.000000e+00 : f32
    %cst_4 = arith.constant 0.000000e+00 : f32
    %12 = vector.broadcast %cst : f32 to vector<16x128xf32>
    %13 = vector.broadcast %cst_4 : f32 to vector<16x128xf32>
    %14 = arith.select %11, %12, %13 : vector<16x128xi1>, vector<16x128xf32>
    %15 = arith.truncf %14 : vector<16x128xf32> to vector<16x128xbf16>
    %c0_5 = arith.constant 0 : index
    %16 = arith.index_cast %4 : i32 to index
    %c0_6 = arith.constant 0 : index
    %c0_7 = arith.constant 0 : index
    %17 = vector.load %arg3[%c0_5, %16, %c0_6, %c0_7] : memref<8x1x16x128xbf16, #tpu.memory_space<vmem>>, vector<1x1x16x128xbf16>
    %18 = vector.shape_cast %17 : vector<1x1x16x128xbf16> to vector<16x128xbf16>
    %19 = vector.shape_cast %15 : vector<16x128xbf16> to vector<1x1x16x128xbf16>
    tpu.vector_store %arg3[%c0_5, %16, %c0_6, %c0_7], %19 {strides = array<i32>} : memref<8x1x16x128xbf16, #tpu.memory_space<vmem>>, vector<1x1x16x128xbf16>,
    %20 = vector.broadcast %2 : f32 to vector<16x128xf32>
    %21 = arith.mulf %20, %7 : vector<16x128xf32>
    %cst_8 = arith.constant 0.000000e+00 : f32
    %22 = vector.broadcast %cst_8 : f32 to vector<16x128xf32>
    %23 = arith.select %11, %22, %21 : vector<16x128xi1>, vector<16x128xf32>
    %c1_i32_9 = arith.constant 1 : i32
    %24 = arith.index_cast %c1_i32_9 : i32 to index
    %25 = arith.index_cast %4 : i32 to index
    %c0_10 = arith.constant 0 : index
    %c0_11 = arith.constant 0 : index
    %26 = vector.load %arg2[%24, %25, %c0_10, %c0_11] : memref<8x1x16x128xf32, #tpu.memory_space<vmem>>, vector<1x1x16x128xf32>
    %27 = vector.shape_cast %26 : vector<1x1x16x128xf32> to vector<16x128xf32>
    %28 = arith.addf %23, %27 : vector<16x128xf32>
    %29 = vector.broadcast %0 : f32 to vector<16x128xf32>
    %30 = arith.mulf %28, %29 : vector<16x128xf32>
    %31 = vector.broadcast %1 : f32 to vector<16x128xf32>
    %32 = arith.cmpf ogt, %30, %31 : vector<16x128xf32>
    %cst_12 = arith.constant 1.000000e+00 : f32
    %cst_13 = arith.constant 0.000000e+00 : f32
    %33 = vector.broadcast %cst_12 : f32 to vector<16x128xf32>
    %34 = vector.broadcast %cst_13 : f32 to vector<16x128xf32>
    %35 = arith.select %32, %33, %34 : vector<16x128xi1>, vector<16x128xf32>
    %36 = arith.truncf %35 : vector<16x128xf32> to vector<16x128xbf16>
    %37 = arith.index_cast %c1_i32_9 : i32 to index
    %38 = arith.index_cast %4 : i32 to index
    %c0_14 = arith.constant 0 : index
    %c0_15 = arith.constant 0 : index
    %39 = vector.load %arg3[%37, %38, %c0_14, %c0_15] : memref<8x1x16x128xbf16, #tpu.memory_space<vmem>>, vector<1x1x16x128xbf16>
    %40 = vector.shape_cast %39 : vector<1x1x16x128xbf16> to vector<16x128xbf16>
    %41 = vector.shape_cast %36 : vector<16x128xbf16> to vector<1x1x16x128xbf16>
    tpu.vector_store %arg3[%37, %38, %c0_14, %c0_15], %41 {strides = array<i32>} : memref<8x1x16x128xbf16, #tpu.memory_space<vmem>>, vector<1x1x16x128xbf16>,
    %42 = vector.broadcast %2 : f32 to vector<16x128xf32>
    %43 = arith.mulf %42, %28 : vector<16x128xf32>
    %cst_16 = arith.constant 0.000000e+00 : f32
    %44 = vector.broadcast %cst_16 : f32 to vector<16x128xf32>
    %45 = arith.select %32, %44, %43 : vector<16x128xi1>, vector<16x128xf32>
    %c2_i32 = arith.constant 2 : i32
    %46 = arith.index_cast %c2_i32 : i32 to index
    %47 = arith.index_cast %4 : i32 to index
    %c0_17 = arith.constant 0 : index
    %c0_18 = arith.constant 0 : index
    %48 = vector.load %arg2[%46, %47, %c0_17, %c0_18] : memref<8x1x16x128xf32, #tpu.memory_space<vmem>>, vector<1x1x16x128xf32>
    %49 = vector.shape_cast %48 : vector<1x1x16x128xf32> to vector<16x128xf32>
    %50 = arith.addf %45, %49 : vector<16x128xf32>
    %51 = vector.broadcast %0 : f32 to vector<16x128xf32>
    %52 = arith.mulf %50, %51 : vector<16x128xf32>
    %53 = vector.broadcast %1 : f32 to vector<16x128xf32>
    %54 = arith.cmpf ogt, %52, %53 : vector<16x128xf32>
    %cst_19 = arith.constant 1.000000e+00 : f32
    %cst_20 = arith.constant 0.000000e+00 : f32
    %55 = vector.broadcast %cst_19 : f32 to vector<16x128xf32>
    %56 = vector.broadcast %cst_20 : f32 to vector<16x128xf32>
    %57 = arith.select %54, %55, %56 : vector<16x128xi1>, vector<16x128xf32>
    %58 = arith.truncf %57 : vector<16x128xf32> to vector<16x128xbf16>
    %59 = arith.index_cast %c2_i32 : i32 to index
    %60 = arith.index_cast %4 : i32 to index
    %c0_21 = arith.constant 0 : index
    %c0_22 = arith.constant 0 : index
    %61 = vector.load %arg3[%59, %60, %c0_21, %c0_22] : memref<8x1x16x128xbf16, #tpu.memory_space<vmem>>, vector<1x1x16x128xbf16>
    %62 = vector.shape_cast %61 : vector<1x1x16x128xbf16> to vector<16x128xbf16>
    %63 = vector.shape_cast %58 : vector<16x128xbf16> to vector<1x1x16x128xbf16>
    tpu.vector_store %arg3[%59, %60, %c0_21, %c0_22], %63 {strides = array<i32>} : memref<8x1x16x128xbf16, #tpu.memory_space<vmem>>, vector<1x1x16x128xbf16>,
    %64 = vector.broadcast %2 : f32 to vector<16x128xf32>
    %65 = arith.mulf %64, %50 : vector<16x128xf32>
    %cst_23 = arith.constant 0.000000e+00 : f32
    %66 = vector.broadcast %cst_23 : f32 to vector<16x128xf32>
    %67 = arith.select %54, %66, %65 : vector<16x128xi1>, vector<16x128xf32>
    %c3_i32 = arith.constant 3 : i32
    %68 = arith.index_cast %c3_i32 : i32 to index
    %69 = arith.index_cast %4 : i32 to index
    %c0_24 = arith.constant 0 : index
    %c0_25 = arith.constant 0 : index
    %70 = vector.load %arg2[%68, %69, %c0_24, %c0_25] : memref<8x1x16x128xf32, #tpu.memory_space<vmem>>, vector<1x1x16x128xf32>
    %71 = vector.shape_cast %70 : vector<1x1x16x128xf32> to vector<16x128xf32>
    %72 = arith.addf %67, %71 : vector<16x128xf32>
    %73 = vector.broadcast %0 : f32 to vector<16x128xf32>
    %74 = arith.mulf %72, %73 : vector<16x128xf32>
    %75 = vector.broadcast %1 : f32 to vector<16x128xf32>
    %76 = arith.cmpf ogt, %74, %75 : vector<16x128xf32>
    %cst_26 = arith.constant 1.000000e+00 : f32
    %cst_27 = arith.constant 0.000000e+00 : f32
    %77 = vector.broadcast %cst_26 : f32 to vector<16x128xf32>
    %78 = vector.broadcast %cst_27 : f32 to vector<16x128xf32>
    %79 = arith.select %76, %77, %78 : vector<16x128xi1>, vector<16x128xf32>
    %80 = arith.truncf %79 : vector<16x128xf32> to vector<16x128xbf16>
    %81 = arith.index_cast %c3_i32 : i32 to index
    %82 = arith.index_cast %4 : i32 to index
    %c0_28 = arith.constant 0 : index
    %c0_29 = arith.constant 0 : index
    %83 = vector.load %arg3[%81, %82, %c0_28, %c0_29] : memref<8x1x16x128xbf16, #tpu.memory_space<vmem>>, vector<1x1x16x128xbf16>
    %84 = vector.shape_cast %83 : vector<1x1x16x128xbf16> to vector<16x128xbf16>
    %85 = vector.shape_cast %80 : vector<16x128xbf16> to vector<1x1x16x128xbf16>
    tpu.vector_store %arg3[%81, %82, %c0_28, %c0_29], %85 {strides = array<i32>} : memref<8x1x16x128xbf16, #tpu.memory_space<vmem>>, vector<1x1x16x128xbf16>,
    %86 = vector.broadcast %2 : f32 to vector<16x128xf32>
    %87 = arith.mulf %86, %72 : vector<16x128xf32>
    %cst_30 = arith.constant 0.000000e+00 : f32
    %88 = vector.broadcast %cst_30 : f32 to vector<16x128xf32>
    %89 = arith.select %76, %88, %87 : vector<16x128xi1>, vector<16x128xf32>
    %c4_i32 = arith.constant 4 : i32
    %90 = arith.index_cast %c4_i32 : i32 to index
    %91 = arith.index_cast %4 : i32 to index
    %c0_31 = arith.constant 0 : index
    %c0_32 = arith.constant 0 : index
    %92 = vector.load %arg2[%90, %91, %c0_31, %c0_32] : memref<8x1x16x128xf32, #tpu.memory_space<vmem>>, vector<1x1x16x128xf32>
    %93 = vector.shape_cast %92 : vector<1x1x16x128xf32> to vector<16x128xf32>
    %94 = arith.addf %89, %93 : vector<16x128xf32>
    %95 = vector.broadcast %0 : f32 to vector<16x128xf32>
    %96 = arith.mulf %94, %95 : vector<16x128xf32>
    %97 = vector.broadcast %1 : f32 to vector<16x128xf32>
    %98 = arith.cmpf ogt, %96, %97 : vector<16x128xf32>
    %cst_33 = arith.constant 1.000000e+00 : f32
    %cst_34 = arith.constant 0.000000e+00 : f32
    %99 = vector.broadcast %cst_33 : f32 to vector<16x128xf32>
    %100 = vector.broadcast %cst_34 : f32 to vector<16x128xf32>
    %101 = arith.select %98, %99, %100 : vector<16x128xi1>, vector<16x128xf32>
    %102 = arith.truncf %101 : vector<16x128xf32> to vector<16x128xbf16>
    %103 = arith.index_cast %c4_i32 : i32 to index
    %104 = arith.index_cast %4 : i32 to index
    %c0_35 = arith.constant 0 : index
    %c0_36 = arith.constant 0 : index
    %105 = vector.load %arg3[%103, %104, %c0_35, %c0_36] : memref<8x1x16x128xbf16, #tpu.memory_space<vmem>>, vector<1x1x16x128xbf16>
    %106 = vector.shape_cast %105 : vector<1x1x16x128xbf16> to vector<16x128xbf16>
    %107 = vector.shape_cast %102 : vector<16x128xbf16> to vector<1x1x16x128xbf16>
    tpu.vector_store %arg3[%103, %104, %c0_35, %c0_36], %107 {strides = array<i32>} : memref<8x1x16x128xbf16, #tpu.memory_space<vmem>>, vector<1x1x16x128xbf16>,
    %108 = vector.broadcast %2 : f32 to vector<16x128xf32>
    %109 = arith.mulf %108, %94 : vector<16x128xf32>
    %cst_37 = arith.constant 0.000000e+00 : f32
    %110 = vector.broadcast %cst_37 : f32 to vector<16x128xf32>
    %111 = arith.select %98, %110, %109 : vector<16x128xi1>, vector<16x128xf32>
    %c5_i32 = arith.constant 5 : i32
    %112 = arith.index_cast %c5_i32 : i32 to index
    %113 = arith.index_cast %4 : i32 to index
    %c0_38 = arith.constant 0 : index
    %c0_39 = arith.constant 0 : index
    %114 = vector.load %arg2[%112, %113, %c0_38, %c0_39] : memref<8x1x16x128xf32, #tpu.memory_space<vmem>>, vector<1x1x16x128xf32>
    %115 = vector.shape_cast %114 : vector<1x1x16x128xf32> to vector<16x128xf32>
    %116 = arith.addf %111, %115 : vector<16x128xf32>
    %117 = vector.broadcast %0 : f32 to vector<16x128xf32>
    %118 = arith.mulf %116, %117 : vector<16x128xf32>
    %119 = vector.broadcast %1 : f32 to vector<16x128xf32>
    %120 = arith.cmpf ogt, %118, %119 : vector<16x128xf32>
    %cst_40 = arith.constant 1.000000e+00 : f32
    %cst_41 = arith.constant 0.000000e+00 : f32
    %121 = vector.broadcast %cst_40 : f32 to vector<16x128xf32>
    %122 = vector.broadcast %cst_41 : f32 to vector<16x128xf32>
    %123 = arith.select %120, %121, %122 : vector<16x128xi1>, vector<16x128xf32>
    %124 = arith.truncf %123 : vector<16x128xf32> to vector<16x128xbf16>
    %125 = arith.index_cast %c5_i32 : i32 to index
    %126 = arith.index_cast %4 : i32 to index
    %c0_42 = arith.constant 0 : index
    %c0_43 = arith.constant 0 : index
    %127 = vector.load %arg3[%125, %126, %c0_42, %c0_43] : memref<8x1x16x128xbf16, #tpu.memory_space<vmem>>, vector<1x1x16x128xbf16>
    %128 = vector.shape_cast %127 : vector<1x1x16x128xbf16> to vector<16x128xbf16>
    %129 = vector.shape_cast %124 : vector<16x128xbf16> to vector<1x1x16x128xbf16>
    tpu.vector_store %arg3[%125, %126, %c0_42, %c0_43], %129 {strides = array<i32>} : memref<8x1x16x128xbf16, #tpu.memory_space<vmem>>, vector<1x1x16x128xbf16>,
    %130 = vector.broadcast %2 : f32 to vector<16x128xf32>
    %131 = arith.mulf %130, %116 : vector<16x128xf32>
    %cst_44 = arith.constant 0.000000e+00 : f32
    %132 = vector.broadcast %cst_44 : f32 to vector<16x128xf32>
    %133 = arith.select %120, %132, %131 : vector<16x128xi1>, vector<16x128xf32>
    %c6_i32 = arith.constant 6 : i32
    %134 = arith.index_cast %c6_i32 : i32 to index
    %135 = arith.index_cast %4 : i32 to index
    %c0_45 = arith.constant 0 : index
    %c0_46 = arith.constant 0 : index
    %136 = vector.load %arg2[%134, %135, %c0_45, %c0_46] : memref<8x1x16x128xf32, #tpu.memory_space<vmem>>, vector<1x1x16x128xf32>
    %137 = vector.shape_cast %136 : vector<1x1x16x128xf32> to vector<16x128xf32>
    %138 = arith.addf %133, %137 : vector<16x128xf32>
    %139 = vector.broadcast %0 : f32 to vector<16x128xf32>
    %140 = arith.mulf %138, %139 : vector<16x128xf32>
    %141 = vector.broadcast %1 : f32 to vector<16x128xf32>
    %142 = arith.cmpf ogt, %140, %141 : vector<16x128xf32>
    %cst_47 = arith.constant 1.000000e+00 : f32
    %cst_48 = arith.constant 0.000000e+00 : f32
    %143 = vector.broadcast %cst_47 : f32 to vector<16x128xf32>
    %144 = vector.broadcast %cst_48 : f32 to vector<16x128xf32>
    %145 = arith.select %142, %143, %144 : vector<16x128xi1>, vector<16x128xf32>
    %146 = arith.truncf %145 : vector<16x128xf32> to vector<16x128xbf16>
    %147 = arith.index_cast %c6_i32 : i32 to index
    %148 = arith.index_cast %4 : i32 to index
    %c0_49 = arith.constant 0 : index
    %c0_50 = arith.constant 0 : index
    %149 = vector.load %arg3[%147, %148, %c0_49, %c0_50] : memref<8x1x16x128xbf16, #tpu.memory_space<vmem>>, vector<1x1x16x128xbf16>
    %150 = vector.shape_cast %149 : vector<1x1x16x128xbf16> to vector<16x128xbf16>
    %151 = vector.shape_cast %146 : vector<16x128xbf16> to vector<1x1x16x128xbf16>
    tpu.vector_store %arg3[%147, %148, %c0_49, %c0_50], %151 {strides = array<i32>} : memref<8x1x16x128xbf16, #tpu.memory_space<vmem>>, vector<1x1x16x128xbf16>,
    %152 = vector.broadcast %2 : f32 to vector<16x128xf32>
    %153 = arith.mulf %152, %138 : vector<16x128xf32>
    %cst_51 = arith.constant 0.000000e+00 : f32
    %154 = vector.broadcast %cst_51 : f32 to vector<16x128xf32>
    %155 = arith.select %142, %154, %153 : vector<16x128xi1>, vector<16x128xf32>
    %c7_i32 = arith.constant 7 : i32
    %156 = arith.index_cast %c7_i32 : i32 to index
    %157 = arith.index_cast %4 : i32 to index
    %c0_52 = arith.constant 0 : index
    %c0_53 = arith.constant 0 : index
    %158 = vector.load %arg2[%156, %157, %c0_52, %c0_53] : memref<8x1x16x128xf32, #tpu.memory_space<vmem>>, vector<1x1x16x128xf32>
    %159 = vector.shape_cast %158 : vector<1x1x16x128xf32> to vector<16x128xf32>
    %160 = arith.addf %155, %159 : vector<16x128xf32>
    %161 = vector.broadcast %0 : f32 to vector<16x128xf32>
    %162 = arith.mulf %160, %161 : vector<16x128xf32>
    %163 = vector.broadcast %1 : f32 to vector<16x128xf32>
    %164 = arith.cmpf ogt, %162, %163 : vector<16x128xf32>
    %cst_54 = arith.constant 1.000000e+00 : f32
    %cst_55 = arith.constant 0.000000e+00 : f32
    %165 = vector.broadcast %cst_54 : f32 to vector<16x128xf32>
    %166 = vector.broadcast %cst_55 : f32 to vector<16x128xf32>
    %167 = arith.select %164, %165, %166 : vector<16x128xi1>, vector<16x128xf32>
    %168 = arith.truncf %167 : vector<16x128xf32> to vector<16x128xbf16>
    %169 = arith.index_cast %c7_i32 : i32 to index
    %170 = arith.index_cast %4 : i32 to index
    %c0_56 = arith.constant 0 : index
    %c0_57 = arith.constant 0 : index
    %171 = vector.load %arg3[%169, %170, %c0_56, %c0_57] : memref<8x1x16x128xbf16, #tpu.memory_space<vmem>>, vector<1x1x16x128xbf16>
    %172 = vector.shape_cast %171 : vector<1x1x16x128xbf16> to vector<16x128xbf16>
    %173 = vector.shape_cast %168 : vector<16x128xbf16> to vector<1x1x16x128xbf16>
    tpu.vector_store %arg3[%169, %170, %c0_56, %c0_57], %173 {strides = array<i32>} : memref<8x1x16x128xbf16, #tpu.memory_space<vmem>>, vector<1x1x16x128xbf16>,
    %174 = vector.broadcast %2 : f32 to vector<16x128xf32>
    %175 = arith.mulf %174, %160 : vector<16x128xf32>
    %cst_58 = arith.constant 0.000000e+00 : f32
    %176 = vector.broadcast %cst_58 : f32 to vector<16x128xf32>
    %177 = arith.select %164, %176, %175 : vector<16x128xi1>, vector<16x128xf32>
    %c7_i32_59 = arith.constant 7 : i32
    %c1_i32_60 = arith.constant 1 : i32
    return
  }
  func.func @transform_0(%arg0: i32) -> i32 {
    %c0_i32 = arith.constant 0 : i32
    %c0_i32_0 = arith.constant 0 : i32
    return %c0_i32 : i32
  }
  func.func @transform_1(%arg0: i32) -> (i32, i32, i32, i32) {
    %c0_i32 = arith.constant 0 : i32
    %c0_i32_0 = arith.constant 0 : i32
    %c0_i32_1 = arith.constant 0 : i32
    %c0_i32_2 = arith.constant 0 : i32
    return %c0_i32, %arg0, %c0_i32_0, %c0_i32_1 : i32, i32, i32, i32
  }
  func.func @transform_2(%arg0: i32) -> (i32, i32, i32, i32) {
    %c0_i32 = arith.constant 0 : i32
    %c0_i32_0 = arith.constant 0 : i32
    %c0_i32_1 = arith.constant 0 : i32
    %c0_i32_2 = arith.constant 0 : i32
    return %c0_i32, %arg0, %c0_i32_0, %c0_i32_1 : i32, i32, i32, i32
  }
}

</mosaic_0001>

<bundles_post_ra>
// kernel: a_lif_forward.1
= control target key start
LH: loop header
LB: loop body
LE: loop exit
PB: predicated region body
PF: predicated region fallthrough
CT: control target
= control target key end

     0   :  { %7 = vsyncpa [#allocation3], 0  ;;  %s504_s0 = inlined_call_operand.vmem [shape: f32[3], index: 0, kind: input, shape index: {}]   ;;  %s505_s1 = inlined_call_operand.vmem [shape: f32[8,1,16,128], index: 1, kind: input, shape index: {}]   ;;  %s506_s2 = inlined_call_operand.vmem [shape: bf16[8,1,16,128], index: 2, kind: output, shape index: {}]  }
   0x1   :  { %s14_s11 = sshll.u32 %s504_s0, 4  ;;  %s15_s11 = int_to_ptr.vmem [resolvable:$true] %s14_s11 }
   0x2   :  { %s330_s12 = scalar_lea.vmem %s15_s11, 16  ;;  %p335_p1 = scmp.lt.s32.totalorder %s15_s11, %s15_s11 }
   0x3   :  { %p331_p0 = scmp.ne.s32.totalorder %s15_s11, %s330_s12  ;;  %p336_p2 = scmp.lt.s32.totalorder %s330_s12, %s330_s12 }
   0x5   :  { %p337_p3 = por %p336_p2, %p335_p1 }
   0x7   :  { %p338_p4 = pnand %p337_p3, %p331_p0 }
   0x9   :  { %341 = shalt.err (!%p338_p4)
}
   0xa   :  { %s344_s13 = smov [#allocation2]  }
   0xb   :  { %17 = dma.vmem_to_smem %s15_s11, 16, %s344_s13, [#allocation3]  }
   0xc   :  { %342 = dma.done.wait [#allocation3], 16  }
   0xd   :  { %343 = vsyncadd [#allocation3], 4294967280 }
   0xe   :  { %23 = sfence }
   0xf   :  { %s24_s14 = sld [smem:[#allocation2]]  ;;  %v27_v0 = vld [vmem:[%s505_s1] sm:$0xff]  ;;  %v28_v1 = vld [vmem:[%s505_s1 + $0x8] sm:$0xff]  ;;  %v239_v9 = vld [vmem:[%s505_s1 + $0x10] sm:$0xff]  ;;  %v345_v11 = vmov 0.0  }
  0x10   :  { %s235_s15 = sld [smem:[#allocation2 + $0x1]]  ;;  %v240_v10 = vld [vmem:[%s505_s1 + $0x18] sm:$0xff]  ;;  %v245_v23 = vld [vmem:[%s505_s1 + $0x20] sm:$0xff]  ;;  %v246_v24 = vld [vmem:[%s505_s1 + $0x28] sm:$0xff] }
  0x11   :  { %s236_s16 = sld [smem:[#allocation2 + $0x2]]  ;;  %v251_v36 = vld [vmem:[%s505_s1 + $0x30] sm:$0xff]  ;;  %v252_v37 = vld [vmem:[%s505_s1 + $0x38] sm:$0xff]  ;;  %v257_v49 = vld [vmem:[%s505_s1 + $0x40] sm:$0xff] }
  0x12   :  { %v258_v50 = vld [vmem:[%s505_s1 + $0x48] sm:$0xff]  ;;  %v263_v62 = vld [vmem:[%s505_s1 + $0x50] sm:$0xff]  ;;  %v264_v63 = vld [vmem:[%s505_s1 + $0x58] sm:$0xff] }
  0x15   :  { %v370_v2 = vstv %s24_s14 }
  0x16   :  { %v30_v3 = vmul.f32 %v370_v2, %v27_v0  ;;  %v31_v4 = vmul.f32 %v370_v2, %v28_v1  ;;  %v374_v5 = vstv %s235_s15 }
  0x17   :  { %v376_v6 = vstv %s236_s16 }
  0x18   :  { %vm33_vm0 = vcmp.gt.f32.partialorder %v30_v3, %v374_v5  ;;  %vm34_vm1 = vcmp.gt.f32.partialorder %v31_v4, %v374_v5  ;;  %v48_v7 = vmul.f32 %v376_v6, %v27_v0  ;;  %v49_v8 = vmul.f32 %v376_v6, %v28_v1 }
  0x19   :  { %v35_v12 = vsel %vm33_vm0, 1.0, %v345_v11  ;;  %v36_v13 = vsel %vm34_vm1, 1.0, %v345_v11 }
  0x1a   :  { %v298_v14 = vpack.c.bf16 %v36_v13, %v35_v12  ;;  %v50_v15 = vsel %vm33_vm0, 0.0, %v48_v7  ;;  %v51_v16 = vsel %vm34_vm1, 0.0, %v49_v8 }
  0x1b   :  { %v55_v17 = vadd.f32 %v239_v9, %v50_v15  ;;  %v56_v18 = vadd.f32 %v240_v10, %v51_v16  ;;  %v269_v15 = vld [vmem:[%s505_s1 + $0x60] sm:$0xff]  ;;  %v270_v16 = vld [vmem:[%s505_s1 + $0x68] sm:$0xff] }
  0x1c   :  { %299 = vst [vmem:[%s506_s2] sm:$0xff] %v298_v14  }
  0x1d   :  { %v57_v19 = vmul.f32 %v55_v17, %v370_v2  ;;  %v58_v20 = vmul.f32 %v56_v18, %v370_v2  ;;  %v74_v21 = vmul.f32 %v55_v17, %v376_v6  ;;  %v75_v22 = vmul.f32 %v56_v18, %v376_v6 }
  0x1f   :  { %vm59_vm2 = vcmp.gt.f32.partialorder %v57_v19, %v374_v5  ;;  %vm60_vm3 = vcmp.gt.f32.partialorder %v58_v20, %v374_v5 }
  0x20   :  { %v61_v25 = vsel %vm59_vm2, 1.0, %v345_v11  ;;  %v62_v26 = vsel %vm60_vm3, 1.0, %v345_v11  ;;  %v76_v27 = vsel %vm59_vm2, 0.0, %v74_v21  ;;  %v77_v28 = vsel %vm60_vm3, 0.0, %v75_v22 }
  0x21   :  { %v301_v29 = vpack.c.bf16 %v62_v26, %v61_v25  ;;  %v81_v30 = vadd.f32 %v245_v23, %v76_v27  ;;  %v82_v31 = vadd.f32 %v246_v24, %v77_v28  ;;  %v275_v28 = vld [vmem:[%s505_s1 + $0x70] sm:$0xff] }
  0x23   :  { %321 = vst [vmem:[%s506_s2 + $0x8] sm:$0xff] %v301_v29   ;;  %v83_v32 = vmul.f32 %v81_v30, %v370_v2  ;;  %v84_v33 = vmul.f32 %v82_v31, %v370_v2  ;;  %v100_v34 = vmul.f32 %v81_v30, %v376_v6  ;;  %v101_v35 = vmul.f32 %v82_v31, %v376_v6  ;;  %v276_v29 = vld [vmem:[%s505_s1 + $0x78] sm:$0xff] }
  0x25   :  { %vm85_vm4 = vcmp.gt.f32.partialorder %v83_v32, %v374_v5  ;;  %vm86_vm5 = vcmp.gt.f32.partialorder %v84_v33, %v374_v5 }
  0x26   :  { %v87_v38 = vsel %vm85_vm4, 1.0, %v345_v11  ;;  %v88_v39 = vsel %vm86_vm5, 1.0, %v345_v11  ;;  %v102_v40 = vsel %vm85_vm4, 0.0, %v100_v34  ;;  %v103_v41 = vsel %vm86_vm5, 0.0, %v101_v35 }
  0x27   :  { %v304_v42 = vpack.c.bf16 %v88_v39, %v87_v38  ;;  %v107_v43 = vadd.f32 %v251_v36, %v102_v40  ;;  %v108_v44 = vadd.f32 %v252_v37, %v103_v41 }
  0x29   :  { %322 = vst [vmem:[%s506_s2 + $0x10] sm:$0xff] %v304_v42   ;;  %v109_v45 = vmul.f32 %v107_v43, %v370_v2  ;;  %v110_v46 = vmul.f32 %v108_v44, %v370_v2  ;;  %v126_v47 = vmul.f32 %v107_v43, %v376_v6  ;;  %v127_v48 = vmul.f32 %v108_v44, %v376_v6 }
  0x2b   :  { %vm111_vm6 = vcmp.gt.f32.partialorder %v109_v45, %v374_v5  ;;  %vm112_vm7 = vcmp.gt.f32.partialorder %v110_v46, %v374_v5 }
  0x2c   :  { %v113_v51 = vsel %vm111_vm6, 1.0, %v345_v11  ;;  %v114_v52 = vsel %vm112_vm7, 1.0, %v345_v11  ;;  %v128_v53 = vsel %vm111_vm6, 0.0, %v126_v47  ;;  %v129_v54 = vsel %vm112_vm7, 0.0, %v127_v48 }
  0x2d   :  { %v307_v55 = vpack.c.bf16 %v114_v52, %v113_v51  ;;  %v133_v56 = vadd.f32 %v257_v49, %v128_v53  ;;  %v134_v57 = vadd.f32 %v258_v50, %v129_v54 }
  0x2f   :  { %323 = vst [vmem:[%s506_s2 + $0x18] sm:$0xff] %v307_v55   ;;  %v135_v58 = vmul.f32 %v133_v56, %v370_v2  ;;  %v136_v59 = vmul.f32 %v134_v57, %v370_v2  ;;  %v152_v60 = vmul.f32 %v133_v56, %v376_v6  ;;  %v153_v61 = vmul.f32 %v134_v57, %v376_v6 }
  0x31   :  { %vm137_vm8 = vcmp.gt.f32.partialorder %v135_v58, %v374_v5  ;;  %vm138_vm9 = vcmp.gt.f32.partialorder %v136_v59, %v374_v5 }
  0x32   :  { %v139_v0 = vsel %vm137_vm8, 1.0, %v345_v11  ;;  %v140_v1 = vsel %vm138_vm9, 1.0, %v345_v11  ;;  %v154_v3 = vsel %vm137_vm8, 0.0, %v152_v60  ;;  %v155_v4 = vsel %vm138_vm9, 0.0, %v153_v61 }
  0x33   :  { %v310_v7 = vpack.c.bf16 %v140_v1, %v139_v0  ;;  %v159_v8 = vadd.f32 %v263_v62, %v154_v3  ;;  %v160_v9 = vadd.f32 %v264_v63, %v155_v4 }
  0x35   :  { %324 = vst [vmem:[%s506_s2 + $0x20] sm:$0xff] %v310_v7   ;;  %v161_v10 = vmul.f32 %v159_v8, %v370_v2  ;;  %v162_v12 = vmul.f32 %v160_v9, %v370_v2  ;;  %v178_v13 = vmul.f32 %v159_v8, %v376_v6  ;;  %v179_v14 = vmul.f32 %v160_v9, %v376_v6 }
  0x37   :  { %vm163_vm10 = vcmp.gt.f32.partialorder %v161_v10, %v374_v5  ;;  %vm164_vm11 = vcmp.gt.f32.partialorder %v162_v12, %v374_v5 }
  0x38   :  { %v165_v17 = vsel %vm163_vm10, 1.0, %v345_v11  ;;  %v166_v18 = vsel %vm164_vm11, 1.0, %v345_v11  ;;  %v180_v19 = vsel %vm163_vm10, 0.0, %v178_v13  ;;  %v181_v20 = vsel %vm164_vm11, 0.0, %v179_v14 }
  0x39   :  { %v313_v21 = vpack.c.bf16 %v166_v18, %v165_v17  ;;  %v185_v22 = vadd.f32 %v269_v15, %v180_v19  ;;  %v186_v23 = vadd.f32 %v270_v16, %v181_v20 }
  0x3b   :  { %325 = vst [vmem:[%s506_s2 + $0x28] sm:$0xff] %v313_v21   ;;  %v187_v24 = vmul.f32 %v185_v22, %v370_v2  ;;  %v188_v25 = vmul.f32 %v186_v23, %v370_v2  ;;  %v204_v26 = vmul.f32 %v185_v22, %v376_v6  ;;  %v205_v27 = vmul.f32 %v186_v23, %v376_v6 }
  0x3d   :  { %vm189_vm12 = vcmp.gt.f32.partialorder %v187_v24, %v374_v5  ;;  %vm190_vm13 = vcmp.gt.f32.partialorder %v188_v25, %v374_v5 }
  0x3e   :  { %v191_v30 = vsel %vm189_vm12, 1.0, %v345_v11  ;;  %v192_v31 = vsel %vm190_vm13, 1.0, %v345_v11  ;;  %v206_v32 = vsel %vm189_vm12, 0.0, %v204_v26  ;;  %v207_v33 = vsel %vm190_vm13, 0.0, %v205_v27 }
  0x3f   :  { %v316_v34 = vpack.c.bf16 %v192_v31, %v191_v30  ;;  %v211_v6 = vadd.f32 %v275_v28, %v206_v32  ;;  %v212_v35 = vadd.f32 %v276_v29, %v207_v33 }
  0x41   :  { %326 = vst [vmem:[%s506_s2 + $0x30] sm:$0xff] %v316_v34   ;;  %v213_v36 = vmul.f32 %v211_v6, %v370_v2  ;;  %v214_v37 = vmul.f32 %v212_v35, %v370_v2 }
  0x43   :  { %vm215_vm14 = vcmp.gt.f32.partialorder %v213_v36, %v374_v5  ;;  %vm216_vm15 = vcmp.gt.f32.partialorder %v214_v37, %v374_v5 }
  0x44   :  { %v217_v38 = vsel %vm215_vm14, 1.0, %v345_v11  ;;  %v218_v39 = vsel %vm216_vm15, 1.0, %v345_v11 }
  0x45   :  { %v319_v40 = vpack.c.bf16 %v218_v39, %v217_v38 }
  0x47   :  { %327 = vst [vmem:[%s506_s2 + $0x38] sm:$0xff] %v319_v40  }
  0x48   :  { %234 = vsyncpa [#allocation3], 1 }

</bundles_post_ra>
